<compile_context>
chip_gen: v6e
topology: v6e:2x2x1
jax: 0.10.0
libtpu: 0.0.40
codegen_flags: <defaults>
</compile_context>

<pallas_src>
import functools

import jax
import jax.numpy as jnp
from jax.experimental import pallas as pl
from jax.experimental.pallas import tpu as pltpu

LANE = 128
TM_MAX = 2048     # (2048, 128) f32 tile; 3 inputs x 2 pipeline buffers = 6 MiB VMEM


def _round_up(a, b):
    return (a + b - 1) // b * b


def _cdiv(a, b):
    return (a + b - 1) // b


def _min_sublane(dtype):
    # Minimum sublane multiple for the (sublane, 128) tile of this dtype.
    return {1: 32, 2: 16, 4: 8}.get(jnp.dtype(dtype).itemsize, 8)


def _num_tensorcores():
    """TensorCore count for the leading 'parallel' grid axis (2 on v7x)."""
    try:
        info = pltpu.get_tpu_info()
        for attr in ("num_cores", "core_count", "num_tensorcores",
                     "tensorcore_count", "num_tensor_cores"):
            v = getattr(info, attr, None)
            if isinstance(v, int) and v > 0:
                return min(v, 4)
    except Exception:
        pass
    try:
        v = getattr(jax.devices()[0], "num_cores", None)
        if isinstance(v, int) and v > 0:
            return min(v, 4)
    except Exception:
        pass
    # Safe default: overflow slots are masked in-kernel, and an over-wide
    # "parallel" axis simply serializes on 1-TC chips.
    return 2


def _masked_mse_kernel(meta_ref, x_ref, y_ref, z_ref, o_ref, acc_ref,
                       *, total_blocks):
    j = pl.program_id(1)
    steps = pl.num_programs(1)
    blk = pl.program_id(0) * steps + j          # global row-tile index (unclamped)
    tm, lane = x_ref.shape

    @pl.when(j == 0)
    def _():
        acc_ref[...] = jnp.zeros_like(acc_ref)

    def _accumulate(keep):
        d = jnp.where(keep,
                      x_ref[...].astype(jnp.float32) - y_ref[...].astype(jnp.float32),
                      0.0)
        sq = d * d
        # Fold the TM rows onto the (8, 128) vector accumulator: pure VPU adds,
        # no per-step cross-lane reduce and no scalar dependency chain.
        acc_ref[...] += jnp.sum(sq.reshape(tm // 8, 8, lane), axis=0)

    # Interior fast path: tile is entirely inside [0, n); only the z-mask.
    @pl.when(blk < total_blocks - 1)
    def _():
        _accumulate(z_ref[...] == 1)

    # Tail / overflow path: also mask by global row (and lane only on the
    # boundary row), so the ragged last tile, any wrapper padding, block
    # padding, and clamped overflow grid slots (blk >= total_blocks, which
    # re-fetch the last tile) contribute exactly zero.
    @pl.when(blk >= total_blocks - 1)
    def _():
        full_rows = meta_ref[0]                 # n // 128
        rem = meta_ref[1]                       # n % 128
        rid = jax.lax.broadcasted_iota(jnp.int32, (tm, lane), 0)
        cid = jax.lax.broadcasted_iota(jnp.int32, (tm, lane), 1)
        row = blk * tm + rid                    # global row index (int32-safe)
        in_bounds = jnp.logical_or(
            row < full_rows,
            jnp.logical_and(row == full_rows, cid < rem))
        _accumulate(jnp.logical_and(in_bounds, z_ref[...] == 1))

    @pl.when(j == steps - 1)
    def _():
        n_f = (meta_ref[0].astype(jnp.float32) * jnp.float32(LANE)
               + meta_ref[1].astype(jnp.float32))
        o_ref[0, 0] = jnp.sum(acc_ref[...]) / n_f


def my_loss(x, y, z):
    """Pallas TPU implementation of My_loss.forward: mean(((z==1)*(x-y))**2)."""
    n = x.size
    xf = x.reshape(-1)
    yf = y.reshape(-1)
    zf = z.reshape(-1)   # native dtype, never cast here (z==1 works in-kernel)

    full_rows, rem = divmod(n, LANE)
    rows = full_rows + (1 if rem else 0)

    # Typical case (n % 128 == 0): zero-copy 2-D view, no padding at all.
    # Ragged case: pad only to the next 128 multiple so the 2-D view exists;
    # the in-kernel row/lane mask makes the pad values irrelevant.
    # TODO(synk): the ragged-n fallback still costs one extra HBM pass (pad copy).
    if rem:
        pad = LANE - rem
        xf = jnp.pad(xf, (0, pad))
        yf = jnp.pad(yf, (0, pad))
        zf = jnp.pad(zf, (0, pad))

    sub = max(_min_sublane(x.dtype), _min_sublane(y.dtype), _min_sublane(z.dtype))
    tm = min(TM_MAX, _round_up(rows, sub))
    total_blocks = _cdiv(rows, tm)
    ncores_hw = _num_tensorcores()
    ncores = ncores_hw if total_blocks >= ncores_hw else 1
    steps = _cdiv(total_blocks, ncores)

    x2 = xf.reshape(rows, LANE)
    y2 = yf.reshape(rows, LANE)
    z2 = zf.reshape(rows, LANE)
    meta = jnp.array([full_rows, rem], dtype=jnp.int32)   # scalar prefetch

    def in_map(p, j, meta_sref):
        # Clamp so padded grid slots re-fetch an in-bounds tile; their
        # contribution is masked to zero inside the kernel.
        return (jnp.minimum(p * steps + j, total_blocks - 1), 0)

    tile_spec = pl.BlockSpec((tm, LANE), in_map)

    out = pl.pallas_call(
        functools.partial(_masked_mse_kernel, total_blocks=total_blocks),
        out_shape=jax.ShapeDtypeStruct((ncores, 1), jnp.float32),
        grid_spec=pltpu.PrefetchScalarGridSpec(
            num_scalar_prefetch=1,
            grid=(ncores, steps),
            in_specs=[tile_spec, tile_spec, tile_spec],
            out_specs=pl.BlockSpec((1, 1), lambda p, j, meta_sref: (p, 0),
                                   memory_space=pltpu.SMEM),
            scratch_shapes=[pltpu.VMEM((8, LANE), jnp.float32)],
        ),
        compiler_params=pltpu.CompilerParams(
            dimension_semantics=("parallel", "arbitrary"),
        ),
        cost_estimate=pl.CostEstimate(
            flops=3 * n,
            transcendentals=0,
            bytes_accessed=int(x.nbytes) + int(y.nbytes) + int(z.nbytes) + 4 * ncores,
        ),
    )(meta, x2, y2, z2)
    # Each per-core partial is already divided by n; summing them gives the mean.
    return jnp.sum(out)


if __name__ == "__main__":
    key = jax.random.PRNGKey(0)
    kx, ky, kz = jax.random.split(key, 3)
    shape = (2, 4, 16, 16)  # NCHW, like typical torch usage
    x = jax.random.normal(kx, shape, dtype=jnp.float32)
    y = jax.random.normal(ky, shape, dtype=jnp.float32)
    # z is a 0/1 mask-like tensor (the module only checks z == 1)
    z = jax.random.bernoulli(kz, p=0.5, shape=shape).astype(jnp.float32)

    loss = jax.block_until_ready(my_loss(x, y, z))

    # reference in plain JAX
    ref = jnp.mean(((z == 1.0).astype(jnp.float32) * (x - y)) ** 2)
    assert jnp.allclose(loss, ref, rtol=1e-6, atol=1e-6), (loss, ref)
    print("KERNEL_OK")
</pallas_src>

<mosaic_0001>
module attributes {stable_mosaic.version = 11 : i64} {
  func.func @_masked_mse_kernel(%arg0: i32, %arg1: i32, %arg2: memref<2xi32, #tpu.memory_space<smem>>, %arg3: memref<16x128xf32, #tpu.memory_space<vmem>>, %arg4: memref<16x128xf32, #tpu.memory_space<vmem>>, %arg5: memref<16x128xf32, #tpu.memory_space<vmem>>, %arg6: memref<1x1xf32, #tpu.memory_space<smem>>, %arg7: memref<8x128xf32, #tpu.memory_space<vmem>>) attributes {dimension_semantics = [#tpu.dimension_semantics<parallel>, #tpu.dimension_semantics<arbitrary>], iteration_bounds = array<i64: 1, 1>, scalar_prefetch = 1 : i64, scratch_operands = 1 : i64, tpu.core_type = #tpu.core_type<tc>, window_params = [{transform_indices = @transform_0, window_bounds = array<i64: 16, 128>}, {transform_indices = @transform_1, window_bounds = array<i64: 16, 128>}, {transform_indices = @transform_2, window_bounds = array<i64: 16, 128>}, {transform_indices = @transform_3, window_bounds = array<i64: 1, 1>}]} {
    %c1_i32 = arith.constant 1 : i32
    %0 = arith.muli %arg0, %c1_i32 : i32
    %1 = arith.addi %0, %arg1 : i32
    %c0_i32 = arith.constant 0 : i32
    %2 = arith.cmpi eq, %arg1, %c0_i32 : i32
    %3 = arith.extui %2 : i1 to i32
    %c0_i32_0 = arith.constant 0 : i32
    %4 = arith.cmpi ne, %3, %c0_i32_0 : i32
    scf.if %4 {
      %cst = arith.constant 0.000000e+00 : f32
      %14 = vector.broadcast %cst : f32 to vector<8x128xf32>
      %c0 = arith.constant 0 : index
      %c0_7 = arith.constant 0 : index
      %15 = vector.load %arg7[%c0, %c0_7] : memref<8x128xf32, #tpu.memory_space<vmem>>, vector<8x128xf32>
      tpu.vector_store %arg7[%c0, %c0_7], %14 {strides = array<i32>} : memref<8x128xf32, #tpu.memory_space<vmem>>, vector<8x128xf32>,
    } else {
    }
    %c0_i32_1 = arith.constant 0 : i32
    %5 = arith.cmpi slt, %1, %c0_i32_1 : i32
    %6 = arith.extui %5 : i1 to i32
    %c0_i32_2 = arith.constant 0 : i32
    %7 = arith.cmpi ne, %6, %c0_i32_2 : i32
    scf.if %7 {
      %c0 = arith.constant 0 : index
      %c0_7 = arith.constant 0 : index
      %14 = vector.load %arg5[%c0, %c0_7] : memref<16x128xf32, #tpu.memory_space<vmem>>, vector<16x128xf32>
      %cst = arith.constant 1.000000e+00 : f32
      %15 = vector.broadcast %cst : f32 to vector<16x128xf32>
      %16 = arith.cmpf oeq, %14, %15 : vector<16x128xf32>
      %c0_8 = arith.constant 0 : index
      %c0_9 = arith.constant 0 : index
      %17 = vector.load %arg3[%c0_8, %c0_9] : memref<16x128xf32, #tpu.memory_space<vmem>>, vector<16x128xf32>
      %c0_10 = arith.constant 0 : index
      %c0_11 = arith.constant 0 : index
      %18 = vector.load %arg4[%c0_10, %c0_11] : memref<16x128xf32, #tpu.memory_space<vmem>>, vector<16x128xf32>
      %19 = arith.subf %17, %18 : vector<16x128xf32>
      %cst_12 = arith.constant 0.000000e+00 : f32
      %20 = vector.broadcast %cst_12 : f32 to vector<16x128xf32>
      %21 = arith.select %16, %19, %20 : vector<16x128xi1>, vector<16x128xf32>
      %22 = arith.mulf %21, %21 : vector<16x128xf32>
      %c0_13 = arith.constant 0 : index
      %c0_14 = arith.constant 0 : index
      %23 = vector.load %arg7[%c0_13, %c0_14] : memref<8x128xf32, #tpu.memory_space<vmem>>, vector<8x128xf32>
      %24 = vector.shape_cast %22 : vector<16x128xf32> to vector<2x8x128xf32>
      %cst_15 = arith.constant dense<0.000000e+00> : vector<8x128xf32>
      %25 = vector.multi_reduction <add>, %24, %cst_15 [0] : vector<2x8x128xf32> to vector<8x128xf32>
      %26 = arith.addf %23, %25 : vector<8x128xf32>
      %c0_16 = arith.constant 0 : index
      %c0_17 = arith.constant 0 : index
      %27 = vector.load %arg7[%c0_16, %c0_17] : memref<8x128xf32, #tpu.memory_space<vmem>>, vector<8x128xf32>
      tpu.vector_store %arg7[%c0_16, %c0_17], %26 {strides = array<i32>} : memref<8x128xf32, #tpu.memory_space<vmem>>, vector<8x128xf32>,
    } else {
    }
    %c0_i32_3 = arith.constant 0 : i32
    %8 = arith.cmpi sge, %1, %c0_i32_3 : i32
    %9 = arith.extui %8 : i1 to i32
    %c0_i32_4 = arith.constant 0 : i32
    %10 = arith.cmpi ne, %9, %c0_i32_4 : i32
    scf.if %10 {
      %c0 = arith.constant 0 : index
      %14 = memref.load %arg2[%c0] : memref<2xi32, #tpu.memory_space<smem>>
      %c1 = arith.constant 1 : index
      %15 = memref.load %arg2[%c1] : memref<2xi32, #tpu.memory_space<smem>>
      %16 = tpu.iota {dimensions = array<i32: 0>} : vector<16x128xi32>
      %17 = tpu.iota {dimensions = array<i32: 1>} : vector<16x128xi32>
      %c16_i32 = arith.constant 16 : i32
      %18 = arith.muli %1, %c16_i32 : i32
      %19 = vector.broadcast %18 : i32 to vector<16x128xi32>
      %20 = arith.addi %19, %16 : vector<16x128xi32>
      %21 = vector.broadcast %14 : i32 to vector<16x128xi32>
      %22 = arith.cmpi slt, %20, %21 : vector<16x128xi32>
      %23 = vector.broadcast %14 : i32 to vector<16x128xi32>
      %24 = arith.cmpi eq, %20, %23 : vector<16x128xi32>
      %25 = vector.broadcast %15 : i32 to vector<16x128xi32>
      %26 = arith.cmpi slt, %17, %25 : vector<16x128xi32>
      %27 = arith.andi %24, %26 : vector<16x128xi1>
      %28 = arith.ori %22, %27 : vector<16x128xi1>
      %c0_7 = arith.constant 0 : index
      %c0_8 = arith.constant 0 : index
      %29 = vector.load %arg5[%c0_7, %c0_8] : memref<16x128xf32, #tpu.memory_space<vmem>>, vector<16x128xf32>
      %cst = arith.constant 1.000000e+00 : f32
      %30 = vector.broadcast %cst : f32 to vector<16x128xf32>
      %31 = arith.cmpf oeq, %29, %30 : vector<16x128xf32>
      %32 = arith.andi %28, %31 : vector<16x128xi1>
      %c0_9 = arith.constant 0 : index
      %c0_10 = arith.constant 0 : index
      %33 = vector.load %arg3[%c0_9, %c0_10] : memref<16x128xf32, #tpu.memory_space<vmem>>, vector<16x128xf32>
      %c0_11 = arith.constant 0 : index
      %c0_12 = arith.constant 0 : index
      %34 = vector.load %arg4[%c0_11, %c0_12] : memref<16x128xf32, #tpu.memory_space<vmem>>, vector<16x128xf32>
      %35 = arith.subf %33, %34 : vector<16x128xf32>
      %cst_13 = arith.constant 0.000000e+00 : f32
      %36 = vector.broadcast %cst_13 : f32 to vector<16x128xf32>
      %37 = arith.select %32, %35, %36 : vector<16x128xi1>, vector<16x128xf32>
      %38 = arith.mulf %37, %37 : vector<16x128xf32>
      %c0_14 = arith.constant 0 : index
      %c0_15 = arith.constant 0 : index
      %39 = vector.load %arg7[%c0_14, %c0_15] : memref<8x128xf32, #tpu.memory_space<vmem>>, vector<8x128xf32>
      %40 = vector.shape_cast %38 : vector<16x128xf32> to vector<2x8x128xf32>
      %cst_16 = arith.constant dense<0.000000e+00> : vector<8x128xf32>
      %41 = vector.multi_reduction <add>, %40, %cst_16 [0] : vector<2x8x128xf32> to vector<8x128xf32>
      %42 = arith.addf %39, %41 : vector<8x128xf32>
      %c0_17 = arith.constant 0 : index
      %c0_18 = arith.constant 0 : index
      %43 = vector.load %arg7[%c0_17, %c0_18] : memref<8x128xf32, #tpu.memory_space<vmem>>, vector<8x128xf32>
      tpu.vector_store %arg7[%c0_17, %c0_18], %42 {strides = array<i32>} : memref<8x128xf32, #tpu.memory_space<vmem>>, vector<8x128xf32>,
    } else {
    }
    %c0_i32_5 = arith.constant 0 : i32
    %11 = arith.cmpi eq, %arg1, %c0_i32_5 : i32
    %12 = arith.extui %11 : i1 to i32
    %c0_i32_6 = arith.constant 0 : i32
    %13 = arith.cmpi ne, %12, %c0_i32_6 : i32
    scf.if %13 {
      %c0 = arith.constant 0 : index
      %14 = memref.load %arg2[%c0] : memref<2xi32, #tpu.memory_space<smem>>
      %15 = arith.sitofp %14 : i32 to f32
      %cst = arith.constant 1.280000e+02 : f32
      %16 = arith.mulf %15, %cst : f32
      %c1 = arith.constant 1 : index
      %17 = memref.load %arg2[%c1] : memref<2xi32, #tpu.memory_space<smem>>
      %18 = arith.sitofp %17 : i32 to f32
      %19 = arith.addf %16, %18 : f32
      %c0_7 = arith.constant 0 : index
      %c0_8 = arith.constant 0 : index
      %20 = vector.load %arg7[%c0_7, %c0_8] : memref<8x128xf32, #tpu.memory_space<vmem>>, vector<8x128xf32>
      %21 = vector.shape_cast %20 : vector<8x128xf32> to vector<1x8x128xf32>
      %cst_9 = arith.constant dense<0.000000e+00> : vector<1xf32>
      %22 = vector.multi_reduction <add>, %21, %cst_9 [1, 2] : vector<1x8x128xf32> to vector<1xf32>
      %23 = vector.shape_cast %22 : vector<1xf32> to vector<1x1x1xf32>
      %24 = vector.extract %23[0, 0, 0] : f32 from vector<1x1x1xf32>
      %25 = arith.divf %24, %19 : f32
      %c0_10 = arith.constant 0 : index
      %c0_11 = arith.constant 0 : index
      %26 = memref.load %arg6[%c0_10, %c0_11] : memref<1x1xf32, #tpu.memory_space<smem>>
      memref.store %25, %arg6[%c0_10, %c0_11] : memref<1x1xf32, #tpu.memory_space<smem>>
    } else {
    }
    return
  }
  func.func @transform_0(%arg0: i32, %arg1: i32, %arg2: memref<2xi32, #tpu.memory_space<smem>>) -> (i32, i32) {
    %c1_i32 = arith.constant 1 : i32
    %0 = arith.muli %arg0, %c1_i32 : i32
    %1 = arith.addi %0, %arg1 : i32
    %c0_i32 = arith.constant 0 : i32
    %2 = arith.minsi %1, %c0_i32 : i32
    %c0_i32_0 = arith.constant 0 : i32
    %c0_i32_1 = arith.constant 0 : i32
    return %2, %c0_i32_0 : i32, i32
  }
  func.func @transform_1(%arg0: i32, %arg1: i32, %arg2: memref<2xi32, #tpu.memory_space<smem>>) -> (i32, i32) {
    %c1_i32 = arith.constant 1 : i32
    %0 = arith.muli %arg0, %c1_i32 : i32
    %1 = arith.addi %0, %arg1 : i32
    %c0_i32 = arith.constant 0 : i32
    %2 = arith.minsi %1, %c0_i32 : i32
    %c0_i32_0 = arith.constant 0 : i32
    %c0_i32_1 = arith.constant 0 : i32
    return %2, %c0_i32_0 : i32, i32
  }
  func.func @transform_2(%arg0: i32, %arg1: i32, %arg2: memref<2xi32, #tpu.memory_space<smem>>) -> (i32, i32) {
    %c1_i32 = arith.constant 1 : i32
    %0 = arith.muli %arg0, %c1_i32 : i32
    %1 = arith.addi %0, %arg1 : i32
    %c0_i32 = arith.constant 0 : i32
    %2 = arith.minsi %1, %c0_i32 : i32
    %c0_i32_0 = arith.constant 0 : i32
    %c0_i32_1 = arith.constant 0 : i32
    return %2, %c0_i32_0 : i32, i32
  }
  func.func @transform_3(%arg0: i32, %arg1: i32, %arg2: memref<2xi32, #tpu.memory_space<smem>>) -> (i32, i32) {
    %c0_i32 = arith.constant 0 : i32
    %c0_i32_0 = arith.constant 0 : i32
    return %arg0, %c0_i32 : i32, i32
  }
}

</mosaic_0001>

<bundles_post_ra>
// kernel: tpu_custom_call.1
= control target key start
LH: loop header
LB: loop body
LE: loop exit
PB: predicated region body
PF: predicated region fallthrough
CT: control target
= control target key end

     0   :  { %s310_s15 = smov [#allocation4]   ;;  %s365_s0 = inlined_call_operand.hbm [shape: s32[2], index: 0, kind: input, shape index: {}]   ;;  %s366_s1 = inlined_call_operand.hbm [shape: f32[16,128], index: 1, kind: input, shape index: {}]   ;;  %s367_s2 = inlined_call_operand.hbm [shape: f32[16,128], index: 2, kind: input, shape index: {}]   ;;  %s368_s3 = inlined_call_operand.hbm [shape: f32[16,128], index: 3, kind: input, shape index: {}]   ;;  %s369_s4 = inlined_call_operand.hbm [shape: f32[1,1], index: 4, kind: output, shape index: {}]  }
   0x1   :  { %10 = dma.hbm_to_smem %s365_s0, 16, %s310_s15, [#allocation3] }
   0x2   :  { %302 = dma.done.wait [#allocation3], 16 }
   0x3   :  { %303 = vsyncadd [#allocation3], 4294967280 }
   0x4   :  { %12 = sfence }
   0x5   :  { %13 = vsyncpa [#allocation6], 0 }
   0x6   :  { %14 = vsyncpa [#allocation9], 0 }
   0x7   :  { %15 = vsyncpa [#allocation7], 0  ;;  %s311_s18 = smov [#allocation8]   ;;  %s312_s20 = smov [#allocation5]  }
   0x8   :  { %s45_s19 = sshll.u32 %s311_s18, 4  ;;  %s27_s21 = sshll.u32 %s312_s20, 4  ;;  %s46_s19 = int_to_ptr.vmem [resolvable:$true] %s45_s19  ;;  %s28_s21 = int_to_ptr.vmem [resolvable:$true] %s27_s21 }
   0x9   :  { %s242_s22 = scalar_lea.vmem %s46_s19, 256  ;;  %p247_p1 = scmp.lt.s32.totalorder %s46_s19, %s46_s19 }
   0xa   :  { %p243_p0 = scmp.ne.s32.totalorder %s46_s19, %s242_s22  ;;  %p248_p2 = scmp.lt.s32.totalorder %s242_s22, %s242_s22 }
   0xc   :  { %p249_p3 = por %p248_p2, %p247_p1 }
   0xe   :  { %p250_p4 = pnand %p249_p3, %p243_p0 }
  0x10   :  { %253 = shalt.err (!%p250_p4)
}
  0x11   :  { %s313_s0 = smov 128   ;;  %s314_s23 = smov 8  }
  0x12   :  { %51 = dma.hbm_to_vmem [thread:$0]  %s367_s2, 256, %s46_s19, [#allocation9], %s313_s0, %s313_s0, %s314_s23  }
  0x13   :  { %s262_s26 = scalar_lea.vmem %s28_s21, 256  ;;  %p267_p6 = scmp.lt.s32.totalorder %s28_s21, %s28_s21 }
  0x14   :  { %p263_p5 = scmp.ne.s32.totalorder %s28_s21, %s262_s26  ;;  %p268_p7 = scmp.lt.s32.totalorder %s262_s26, %s262_s26 }
  0x16   :  { %p269_p8 = por %p268_p7, %p267_p6 }
  0x18   :  { %p270_p9 = pnand %p269_p8, %p263_p5 }
  0x1a   :  { %273 = shalt.err (!%p270_p9)
}
  0x1b   :  { %33 = dma.hbm_to_vmem [thread:$0]  %s366_s1, 256, %s28_s21, [#allocation6], %s313_s0, %s313_s0, %s314_s23  }
  0x1c   :  { %s315_s29 = smov [#allocation10]  }
  0x1d   :  { %s63_s30 = sshll.u32 %s315_s29, 4  ;;  %s64_s30 = int_to_ptr.vmem [resolvable:$true] %s63_s30 }
  0x1e   :  { %s282_s5 = scalar_lea.vmem %s64_s30, 256  ;;  %p287_p11 = scmp.lt.s32.totalorder %s64_s30, %s64_s30 }
  0x1f   :  { %p283_p10 = scmp.ne.s32.totalorder %s64_s30, %s282_s5  ;;  %p288_p12 = scmp.lt.s32.totalorder %s282_s5, %s282_s5 }
  0x21   :  { %p289_p13 = por %p288_p12, %p287_p11 }
  0x23   :  { %p290_p0 = pnand %p289_p13, %p283_p10 }
  0x25   :  { %293 = shalt.err (!%p290_p0)
}
  0x26   :  { %69 = dma.hbm_to_vmem [thread:$0]  %s368_s3, 256, %s64_s30, [#allocation9], %s313_s0, %s313_s0, %s314_s23  }
  0x27   :  { %304 = dma.done.wait [#allocation6], 256  }
  0x28   :  { %305 = vsyncadd [#allocation6], 4294967040 }
  0x29   :  { %306 = dma.done.wait [#allocation9], 512  }
  0x2a   :  { %307 = vsyncadd [#allocation9], 4294966784  ;;  %v125_v0 = vlaneseq  ;;  %s354_s1 = sld [smem:[#allocation4]]  ;;  %v145_v6 = vld [vmem:[#allocation10] sm:$0xff]  ;;  %v153_v8 = vld [vmem:[#allocation8] sm:$0xff]  ;;  %s316_s14 = smov [#allocation11]  }
  0x2b   :  { %s356_s7 = sld [smem:[#allocation4 + $0x1]]  ;;  %v151_v7 = vld [vmem:[#allocation5] sm:$0xff]  ;;  %v146_v9 = vld [vmem:[#allocation10 + $0x8] sm:$0xff]  ;;  %v154_v11 = vld [vmem:[#allocation8 + $0x8] sm:$0xff]  ;;  %vm147_vm7 = vcmp.eq.f32.partialorder %v145_v6, 1.0 }
  0x2c   :  { %v126_v1 = vshrl.u32 %v125_v0, 7  ;;  %v129_v3 = vand.u32 127, %v125_v0  ;;  %v152_v10 = vld [vmem:[#allocation5 + $0x8] sm:$0xff]  ;;  %v155_v12 = vsub.f32 %v151_v7, %v153_v8  ;;  %vm148_vm9 = vcmp.eq.f32.partialorder %v146_v9, 1.0 }
  0x2d   :  { %v156_v13 = vsub.f32 %v152_v10, %v154_v11 }
  0x2e   :  { %v127_v2 = vadd.s32 8, %v126_v1 }
  0x30   :  { %v134_v4 = vstv %s354_s1  ;;  %s169_s3 = scvt.s32.f32 %s354_s1 }
  0x31   :  { %vm137_vm0 = vcmp.eq.s32.totalorder %v126_v1, %v134_v4  ;;  %vm138_vm1 = vcmp.eq.s32.totalorder %v127_v2, %v134_v4  ;;  %v139_v5 = vstv %s356_s7  ;;  %vm135_vm2 = vcmp.lt.s32.totalorder %v126_v1, %v134_v4  ;;  %s172_s9 = scvt.s32.f32 %s356_s7 }
  0x32   :  { %vm140_vm3 = vcmp.lt.s32.totalorder %v129_v3, %v139_v5  ;;  %vm136_vm4 = vcmp.lt.s32.totalorder %v127_v2, %v134_v4  ;;  %s170_s8 = smul.f32 128.0, %s169_s3 }
  0x33   :  { %vm141_vm5 = vmand %vm137_vm0, %vm140_vm3 }
  0x34   :  { %vm142_vm6 = vmand %vm138_vm1, %vm140_vm3  ;;  %s173_s10 = sadd.f32 %s172_s9, %s170_s8 }
  0x35   :  { %vm143_vm8 = vmor %vm135_vm2, %vm141_vm5 }
  0x36   :  { %vm144_vm10 = vmor %vm136_vm4, %vm142_vm6  ;;  %v184_v19 = vstv %s173_s10 }
  0x37   :  { %vm149_vm11 = vmand %vm143_vm8, %vm147_vm7  ;;  %224 = vrcp.f32 %v184_v19 }
  0x38   :  { %vm150_vm12 = vmand %vm144_vm10, %vm148_vm9  ;;  %v157_v14 = vsel %vm149_vm11, %v155_v12, 0.0 }
  0x39   :  { %v158_v15 = vsel %vm150_vm12, %v156_v13, 0.0  ;;  %v159_v16 = vmul.f32 %v157_v14, %v157_v14 }
  0x3a   :  { %v160_v17 = vmul.f32 %v158_v15, %v158_v15 }
  0x3c   :  { %v162_v18 = vadd.f32 %v160_v17, %v159_v16 }
  0x3e   :  { %175 = vadd.xlane.f32.xlu0 %v162_v18 }
  0x44   :  { %v225_v26 = vpop.eup %224 }
  0xc7   :  { %v176_v20 = vpop.xlane.xlu0 %175 }
  0xc8   :  { %v177_v21 = vrot.slane %v176_v20, 4 }
  0xca   :  { %v178_v22 = vadd.f32 %v177_v21, %v176_v20 }
  0xcc   :  { %v179_v23 = vrot.slane %v178_v22, 2 }
  0xce   :  { %v180_v24 = vadd.f32 %v179_v23, %v178_v22 }
  0xd0   :  { %v181_v25 = vrot.slane %v180_v24, 1 }
  0xd2   :  { %v182_v27 = vadd.f32 %v181_v25, %v180_v24 }
  0xd4   :  { %213 = vpush %v182_v27 }
  0xd5   :  { %215 = vpush %v225_v26 }
 0x105   :  { %s214_s11 = spop %213 }
 0x106   :  { %s216_s12 = spop %215 }
 0x107   :  { %s187_s13 = smul.f32 %s216_s12, %s214_s11 }
 0x109   :  { %189 = sst [smem:[#allocation11]] %s187_s13 }
 0x10a   :  { %197 = dma.smem_to_hbm %s316_s14, 16, %s369_s4, [#allocation7]  }
 0x10b   :  { %308 = dma.done.wait [#allocation7], 16  }
 0x10c   :  { %309 = vsyncadd [#allocation7], 4294967280 }
 0x10d   :  { %201 = sfence }
 0x10e   :  { %202 = vsyncpa [#allocation6], 1 }
 0x10f   :  { %203 = vsyncpa [#allocation9], 1 }
 0x110   :  { %204 = vsyncpa [#allocation7], 1 }

</bundles_post_ra>
